<compile_context>
chip_gen: v6e
topology: v6e:2x2x1
jax: 0.10.0
libtpu: 0.0.40
codegen_flags: <defaults>
</compile_context>

<pallas_src>
import jax
import jax.numpy as jnp
from jax.experimental import pallas as pl
from jax.experimental.pallas import tpu as pltpu


def _dropout2d_kernel(x_ref, s_ref, o_ref):
    # x_ref : (ROWS, T)  input tile  -- one row == one (batch, channel) plane
    # s_ref : (ROWS, 1)  f32 per-row scale: 0.0 if dropped, 1/(1-p) if kept
    # o_ref : (ROWS, T)  output tile
    o_ref[...] = (x_ref[...].astype(jnp.float32) * s_ref[...]).astype(o_ref.dtype)


def fixable_2d_dropout(x, seed, p=0.5, training=True):
    """Forward pass of Fixable2DDropout. x: (B, C, H, W); seed: int; p: static float."""
    if p < 0.0 or p > 1.0:
        raise ValueError(
            "dropout probability has to be between 0 and 1, but got {}".format(p))
    # TODO(synk): torch's `inplace` flag and global manual_seed bookkeeping have
    # no meaning for functional JAX arrays; the "fixable"/lazy_load behavior is
    # provided by the explicit `seed` argument (same seed -> same mask).
    if not training or p == 0.0:
        return x
    if p == 1.0:
        return jnp.zeros_like(x)

    B, C, H, W = x.shape
    R, HW = B * C, H * W
    elem = jnp.dtype(x.dtype).itemsize

    # Per-(batch, channel) scale, deterministic from `seed` (the "fixable" part).
    # Dropped channels get 0.0, kept channels 1/(1-p); P(keep) = 1 - p.
    key = jax.random.PRNGKey(int(seed))
    keep = jax.random.bernoulli(key, 1.0 - float(p), (R, 1))
    scale = jnp.where(keep, jnp.float32(1.0 / (1.0 - float(p))), jnp.float32(0.0))

    x2 = x.reshape(R, HW)  # contiguous merge of trailing dims: free

    # ---- tile selection: full-sublane rows x lane-dense spatial, ~2 MiB/block
    LANE = 128
    sub = max(8, 32 // elem)                     # sublane pack (f32:8, bf16:16, i8:32)
    target = 2 * 1024 * 1024                     # ~2 MiB x-block target
    T = min(-(-HW // LANE) * LANE, 4096)         # lane tile, multiple of 128
    rows_cap = max(sub, (target // (T * elem)) // sub * sub)
    ROWS = min(-(-R // sub) * sub, rows_cap)     # sublane-aligned row tile

    grid = (pl.cdiv(R, ROWS), pl.cdiv(HW, T))

    cost = pl.CostEstimate(
        flops=R * HW,                            # one multiply per element
        transcendentals=0,
        bytes_accessed=2 * R * HW * elem + R * 4,
    )

    out2 = pl.pallas_call(
        _dropout2d_kernel,
        out_shape=jax.ShapeDtypeStruct((R, HW), x.dtype),
        grid_spec=pltpu.PrefetchScalarGridSpec(
            num_scalar_prefetch=0,
            grid=grid,
            in_specs=[
                pl.BlockSpec((ROWS, T), lambda r, s: (r, s)),   # x tile
                pl.BlockSpec((ROWS, 1), lambda r, s: (r, 0)),   # per-row scale
            ],
            out_specs=pl.BlockSpec((ROWS, T), lambda r, s: (r, s)),
        ),
        compiler_params=pltpu.CompilerParams(
            dimension_semantics=("parallel", "parallel"),
            vmem_limit_bytes=32 * 1024 * 1024),
        cost_estimate=cost,
    )(x2, scale)

    return out2.reshape(B, C, H, W)


if __name__ == "__main__":
    key = jax.random.PRNGKey(0)
    B, C, H, W = 2, 4, 16, 16
    p = 0.5
    seed = 1234

    x = jax.random.normal(key, (B, C, H, W), dtype=jnp.float32)

    out = fixable_2d_dropout(x, seed, p=p, training=True)
    out = jax.block_until_ready(out)
    assert out.shape == (B, C, H, W)

    # dropout2d semantics: each (b, c) channel is either entirely zeroed or
    # entirely equal to x / (1 - p).
    kept = jnp.max(jnp.abs(out), axis=(2, 3)) > 0                    # (B, C)
    expected = jnp.where(kept[:, :, None, None], x / (1.0 - p), 0.0)
    assert jnp.allclose(out, expected, atol=1e-5, rtol=1e-5)

    # "fixable": the same seed reproduces the same mask.
    out2 = jax.block_until_ready(fixable_2d_dropout(x, seed, p=p, training=True))
    assert jnp.allclose(out, out2)

    # eval mode is the identity.
    out_eval = fixable_2d_dropout(x, seed, p=p, training=False)
    assert jnp.allclose(out_eval, x)

    print("KERNEL_OK")
</pallas_src>

<mosaic_0001>
module attributes {stable_mosaic.version = 11 : i64} {
  func.func @_dropout2d_kernel(%arg0: i32, %arg1: i32, %arg2: memref<8x256xf32, #tpu.memory_space<vmem>>, %arg3: memref<8x1xf32, #tpu.memory_space<vmem>>, %arg4: memref<8x256xf32, #tpu.memory_space<vmem>>) attributes {dimension_semantics = [#tpu.dimension_semantics<parallel>, #tpu.dimension_semantics<parallel>], iteration_bounds = array<i64: 1, 1>, scalar_prefetch = 0 : i64, scratch_operands = 0 : i64, tpu.core_type = #tpu.core_type<tc>, window_params = [{transform_indices = @transform_0, window_bounds = array<i64: 8, 256>}, {transform_indices = @transform_1, window_bounds = array<i64: 8, 1>}, {transform_indices = @transform_2, window_bounds = array<i64: 8, 256>}]} {
    %c0 = arith.constant 0 : index
    %c0_0 = arith.constant 0 : index
    %0 = vector.load %arg2[%c0, %c0_0] : memref<8x256xf32, #tpu.memory_space<vmem>>, vector<8x256xf32>
    %c0_1 = arith.constant 0 : index
    %c0_2 = arith.constant 0 : index
    %1 = vector.load %arg3[%c0_1, %c0_2] : memref<8x1xf32, #tpu.memory_space<vmem>>, vector<8x1xf32>
    %2 = vector.broadcast %1 : vector<8x1xf32> to vector<8x256xf32>
    %3 = arith.mulf %0, %2 : vector<8x256xf32>
    %c0_3 = arith.constant 0 : index
    %c0_4 = arith.constant 0 : index
    %4 = vector.load %arg4[%c0_3, %c0_4] : memref<8x256xf32, #tpu.memory_space<vmem>>, vector<8x256xf32>
    tpu.vector_store %arg4[%c0_3, %c0_4], %3 {strides = array<i32>} : memref<8x256xf32, #tpu.memory_space<vmem>>, vector<8x256xf32>,
    return
  }
  func.func @transform_0(%arg0: i32, %arg1: i32) -> (i32, i32) {
    %c0_i32 = arith.constant 0 : i32
    return %arg0, %arg1 : i32, i32
  }
  func.func @transform_1(%arg0: i32, %arg1: i32) -> (i32, i32) {
    %c0_i32 = arith.constant 0 : i32
    %c0_i32_0 = arith.constant 0 : i32
    return %arg0, %c0_i32 : i32, i32
  }
  func.func @transform_2(%arg0: i32, %arg1: i32) -> (i32, i32) {
    %c0_i32 = arith.constant 0 : i32
    return %arg0, %arg1 : i32, i32
  }
}

</mosaic_0001>

<bundles_post_ra>
// kernel: tpu_custom_call.1
= control target key start
LH: loop header
LB: loop body
LE: loop exit
PB: predicated region body
PF: predicated region fallthrough
CT: control target
= control target key end

     0   :  { %7 = vsyncpa [#allocation3], 0  ;;  %s126_s0 = inlined_call_operand.hbm [shape: f32[8,256], index: 0, kind: input, shape index: {}]   ;;  %s127_s1 = inlined_call_operand.vmem [shape: f32[8,1], index: 1, kind: input, shape index: {}]   ;;  %s128_s2 = inlined_call_operand.hbm [shape: f32[8,256], index: 2, kind: output, shape index: {}]  }
   0x1   :  { %8 = vsyncpa [#allocation4], 0  ;;  %s99_s9 = smov [#allocation2]  }
   0x2   :  { %s15_s10 = sshll.u32 %s99_s9, 4  ;;  %s16_s10 = int_to_ptr.vmem [resolvable:$true] %s15_s10 }
   0x3   :  { %s63_s11 = scalar_lea.vmem %s16_s10, 256  ;;  %p68_p1 = scmp.lt.s32.totalorder %s16_s10, %s16_s10 }
   0x4   :  { %p64_p0 = scmp.ne.s32.totalorder %s16_s10, %s63_s11  ;;  %p69_p2 = scmp.lt.s32.totalorder %s63_s11, %s63_s11 }
   0x6   :  { %p70_p3 = por %p69_p2, %p68_p1 }
   0x8   :  { %p71_p4 = pnand %p70_p3, %p64_p0 }
   0xa   :  { %74 = shalt.err (!%p71_p4)
}
   0xb   :  { %18 = dma.hbm_to_vmem [thread:$0]  %s126_s0, 256, %s16_s10, [#allocation3]  }
   0xc   :  { %95 = dma.done.wait [#allocation3], 256  }
   0xd   :  { %96 = vsyncadd [#allocation3], 4294967040  ;;  %v100_v0 = vmov 0   ;;  %v26_v1 = vld [vmem:[%s127_s1] sm:$0xff]  ;;  %v25_v3 = vld [vmem:[#allocation2 + $0x8] sm:$0xff]  ;;  %s101_s16 = smov [#allocation5]  }
   0xe   :  { %54 = vset.pattern.permute.xlu0 %v100_v0  ;;  %v24_v2 = vld [vmem:[#allocation2] sm:$0xff]  ;;  %s42_s17 = sshll.u32 %s101_s16, 4  ;;  %s43_s17 = int_to_ptr.vmem [resolvable:$true] %s42_s17 }
   0xf   :  { %29 = vperm.xlu0 %54, %v26_v1   ;;  %s75_s0 = scalar_lea.vmem %s43_s17, 256  ;;  %p80_p6 = scmp.lt.s32.totalorder %s43_s17, %s43_s17 }
  0x10   :  { %p76_p5 = scmp.ne.s32.totalorder %s43_s17, %s75_s0  ;;  %p81_p7 = scmp.lt.s32.totalorder %s75_s0, %s75_s0 }
  0x12   :  { %p82_p8 = por %p81_p7, %p80_p6 }
  0x14   :  { %p83_p9 = pnand %p82_p8, %p76_p5 }
  0x8a   :  { %v30_v4 = vpop.permute.xlu0 %29 }
  0x8b   :  { %v32_v5 = vmul.f32 %v30_v4, %v24_v2  ;;  %v33_v6 = vmul.f32 %v30_v4, %v25_v3 }
  0x8d   :  { %34 = vst [vmem:[#allocation5] sm:$0xff] %v32_v5  ;;  %35 = vst [vmem:[#allocation5 + $0x8] sm:$0xff] %v33_v6 }
  0x8e   :  { %86 = shalt.err (!%p83_p9)
}
  0x8f   :  { %45 = dma.vmem_to_hbm [thread:$0]  %s43_s17, 256, %s128_s2, [#allocation4]  }
  0x90   :  { %97 = dma.done.wait [#allocation4], 256  }
  0x91   :  { %98 = vsyncadd [#allocation4], 4294967040 }
  0x92   :  { %49 = vsyncpa [#allocation3], 1 }
  0x93   :  { %50 = vsyncpa [#allocation4], 1 }

</bundles_post_ra>
